<compile_context>
chip_gen: v6e
topology: v6e:2x2x1
jax: 0.10.0
libtpu: 0.0.40
codegen_flags: <defaults>
</compile_context>

<pallas_src>
import functools

import jax
import jax.numpy as jnp
from jax.experimental import pallas as pl
from jax.experimental.pallas import tpu as pltpu


def _focal_kernel(x_ref, t_ref, out_ref, *,
                  num_classes, ignore_label, alpha, gamma):
    x = x_ref[...].astype(jnp.float32)       # (Cpad, TP) logits, class-major
    t = t_ref[...]                           # (1,   TP) int32 labels

    cpad, _ = x.shape
    cls = jax.lax.broadcasted_iota(jnp.int32, (cpad, 1), 0)   # class id per sublane
    class_ok = cls < num_classes                              # mask padded classes

    # numerically-stable masked softmax over the class (sublane) axis
    xm = jnp.where(class_ok, x, jnp.float32(-1e30))
    m = jnp.max(xm, axis=0, keepdims=True)                    # (1, TP)
    e = jnp.where(class_ok, jnp.exp(xm - m), 0.0)             # (Cpad, TP)
    denom = jnp.sum(e, axis=0, keepdims=True)                 # (1, TP)

    # one-hot gather of the target-class numerator; never build the full prob matrix
    onehot = cls == t                                         # (Cpad, TP)
    e_t = jnp.sum(jnp.where(onehot, e, 0.0), axis=0, keepdims=True)   # (1, TP)

    p_t = jnp.clip(e_t / denom, 1e-8, 1.0)                    # (1, TP)

    one_m = 1.0 - p_t
    if gamma == 2.0:                         # static choice: square on the VPU
        focal = one_m * one_m
    elif gamma == 1.0:
        focal = one_m
    else:
        focal = jnp.power(one_m, gamma)
    loss = (-alpha) * focal * jnp.log(p_t)                    # (1, TP)

    # valid pixels: 0 <= target and target != ignore_label
    valid = jnp.logical_and(t >= 0, t != ignore_label)
    loss = jnp.where(valid, loss, 0.0)

    loss_sum = jnp.sum(loss)
    cnt_sum = jnp.sum(valid.astype(jnp.float32))

    # per-tile partials in a lane-dense (8, 128) block:
    #   [0, 0] = loss sum, [0, 1] = valid count, zeros elsewhere
    sub = jax.lax.broadcasted_iota(jnp.int32, (8, 128), 0)
    lane = jax.lax.broadcasted_iota(jnp.int32, (8, 128), 1)
    flat = sub * 128 + lane
    out = jnp.where(flat == 0, loss_sum, 0.0)
    out = jnp.where(flat == 1, cnt_sum, out)
    out_ref[...] = out


def focal_loss_2d(cls_preds, cls_targets, *,
                  num_classes=19, ignore_label=250, alpha=0.25, gamma=2.0,
                  size_average=True, tile_pixels=2048):
    """cls_preds: (n, c, h, w) float; cls_targets: (n, h, w) int."""
    n, c, h, w = cls_preds.shape
    assert cls_targets.shape == (n, h, w)
    assert c == num_classes
    assert tile_pixels % 128 == 0

    hw = h * w
    # pixels -> 128-lane axis; clamp the tile for small images
    tp = min(tile_pixels, ((hw + 127) // 128) * 128)
    hw_pad = ((hw + tp - 1) // tp) * tp
    # classes -> sublane axis, padded to the f32 sublane tile (8)
    cpad = ((c + 7) // 8) * 8

    x = cls_preds.reshape(n, c, hw)
    x = jnp.pad(x, ((0, 0), (0, cpad - c), (0, hw_pad - hw)))
    t = cls_targets.reshape(n, 1, hw).astype(jnp.int32)
    t = jnp.pad(t, ((0, 0), (0, 0), (0, hw_pad - hw)),
                constant_values=jnp.int32(ignore_label))  # padded pixels ignored

    ntiles = hw_pad // tp
    grid = (n, ntiles)
    kernel = functools.partial(
        _focal_kernel,
        num_classes=num_classes,
        ignore_label=ignore_label,
        alpha=float(alpha),
        gamma=float(gamma),
    )

    partials = pl.pallas_call(
        kernel,
        grid=grid,
        in_specs=[
            pl.BlockSpec((None, cpad, tp), lambda b, i: (b, 0, i)),
            pl.BlockSpec((None, 1, tp), lambda b, i: (b, 0, i)),
        ],
        out_specs=pl.BlockSpec((None, None, 8, 128),
                               lambda b, i: (b, i, 0, 0)),
        out_shape=jax.ShapeDtypeStruct((n, ntiles, 8, 128), jnp.float32),
        compiler_params=pltpu.CompilerParams(
            dimension_semantics=("parallel", "parallel")),
    )(x, t)

    totals = jnp.sum(partials, axis=(0, 1, 2))   # (128,) — tree reduce in JAX
    loss_sum = totals[0]
    valid_cnt = totals[1]
    if size_average:
        # matches torch .mean() over the valid (non-ignored) elements;
        # NaN if every pixel is ignored, same as the PyTorch module.
        return loss_sum / valid_cnt
    return loss_sum


def _reference(cls_preds, cls_targets, *, num_classes, ignore_label, alpha,
               gamma, size_average):
    n, c, h, w = cls_preds.shape
    prob = jax.nn.softmax(cls_preds.astype(jnp.float32), axis=1)
    prob = jnp.transpose(prob, (0, 2, 3, 1)).reshape(-1, c)
    t = cls_targets.reshape(-1)
    mask = jnp.logical_and(t >= 0, t != ignore_label)
    onehot = jax.nn.one_hot(jnp.clip(t, 0, c - 1), c, dtype=jnp.float32)
    p = jnp.clip(jnp.sum(prob * onehot, axis=1), 1e-8, 1.0)
    loss = -alpha * jnp.power(1.0 - p, gamma) * jnp.log(p)
    loss = jnp.where(mask, loss, 0.0)
    if size_average:
        return jnp.sum(loss) / jnp.sum(mask.astype(jnp.float32))
    return jnp.sum(loss)


if __name__ == "__main__":
    num_classes = 19
    ignore_label = 250
    alpha = 0.25
    gamma = 2.0

    key = jax.random.PRNGKey(0)
    k1, k2, k3 = jax.random.split(key, 3)

    n, c, h, w = 2, num_classes, 16, 16
    cls_preds = jax.random.normal(k1, (n, c, h, w), dtype=jnp.float32)
    cls_targets = jax.random.randint(k2, (n, h, w), 0, num_classes,
                                     dtype=jnp.int32)
    # sprinkle some ignore-labels so the mask path is exercised
    ignore_mask = jax.random.bernoulli(k3, 0.1, (n, h, w))
    cls_targets = jnp.where(ignore_mask, jnp.int32(ignore_label), cls_targets)

    loss = focal_loss_2d(cls_preds, cls_targets,
                         num_classes=num_classes, ignore_label=ignore_label,
                         alpha=alpha, gamma=gamma, size_average=True)
    loss = jax.block_until_ready(loss)

    ref = _reference(cls_preds, cls_targets, num_classes=num_classes,
                     ignore_label=ignore_label, alpha=alpha, gamma=gamma,
                     size_average=True)

    assert jnp.allclose(loss, ref, rtol=1e-5, atol=1e-6), (loss, ref)
    print("KERNEL_OK")
</pallas_src>

<mosaic_0001>
module attributes {stable_mosaic.version = 11 : i64} {
  func.func @_focal_kernel(%arg0: i32, %arg1: i32, %arg2: memref<1x24x256xf32, #tpu.memory_space<vmem>>, %arg3: memref<1x1x256xi32, #tpu.memory_space<vmem>>, %arg4: memref<1x1x8x128xf32, #tpu.memory_space<vmem>>) attributes {dimension_semantics = [#tpu.dimension_semantics<parallel>, #tpu.dimension_semantics<parallel>], iteration_bounds = array<i64: 2, 1>, scalar_prefetch = 0 : i64, scratch_operands = 0 : i64, tpu.core_type = #tpu.core_type<tc>, window_params = [{transform_indices = @transform_0, window_bounds = array<i64: 1, 24, 256>}, {transform_indices = @transform_1, window_bounds = array<i64: 1, 1, 256>}, {transform_indices = @transform_2, window_bounds = array<i64: 1, 1, 8, 128>}]} {
    %c0 = arith.constant 0 : index
    %c0_0 = arith.constant 0 : index
    %c0_1 = arith.constant 0 : index
    %0 = vector.load %arg2[%c0, %c0_0, %c0_1] : memref<1x24x256xf32, #tpu.memory_space<vmem>>, vector<1x24x256xf32>
    %1 = vector.shape_cast %0 : vector<1x24x256xf32> to vector<24x256xf32>
    %c0_2 = arith.constant 0 : index
    %c0_3 = arith.constant 0 : index
    %c0_4 = arith.constant 0 : index
    %2 = vector.load %arg3[%c0_2, %c0_3, %c0_4] : memref<1x1x256xi32, #tpu.memory_space<vmem>>, vector<1x1x256xi32>
    %3 = vector.shape_cast %2 : vector<1x1x256xi32> to vector<1x256xi32>
    %4 = tpu.iota {dimensions = array<i32: 0>} : vector<24x1xi32>
    %c19_i32 = arith.constant 19 : i32
    %5 = vector.broadcast %c19_i32 : i32 to vector<24x1xi32>
    %6 = arith.cmpi slt, %4, %5 : vector<24x1xi32>
    %cst = arith.constant -1.000000e+30 : f32
    %7 = vector.shape_cast %6 : vector<24x1xi1> to vector<24x1xi1>
    %8 = vector.broadcast %7 : vector<24x1xi1> to vector<24x256xi1>
    %9 = vector.broadcast %cst : f32 to vector<24x256xf32>
    %10 = arith.select %8, %1, %9 : vector<24x256xi1>, vector<24x256xf32>
    %cst_5 = arith.constant dense<0xFF800000> : vector<256xf32>
    %11 = vector.multi_reduction <maximumf>, %10, %cst_5 [0] : vector<24x256xf32> to vector<256xf32>
    %12 = vector.shape_cast %11 : vector<256xf32> to vector<1x256xf32>
    %13 = vector.broadcast %12 : vector<1x256xf32> to vector<24x256xf32>
    %14 = arith.subf %10, %13 : vector<24x256xf32>
    %15 = math.exp %14 : vector<24x256xf32>
    %cst_6 = arith.constant 0.000000e+00 : f32
    %16 = vector.shape_cast %6 : vector<24x1xi1> to vector<24x1xi1>
    %17 = vector.broadcast %16 : vector<24x1xi1> to vector<24x256xi1>
    %18 = vector.broadcast %cst_6 : f32 to vector<24x256xf32>
    %19 = arith.select %17, %15, %18 : vector<24x256xi1>, vector<24x256xf32>
    %cst_7 = arith.constant dense<0.000000e+00> : vector<256xf32>
    %20 = vector.multi_reduction <add>, %19, %cst_7 [0] : vector<24x256xf32> to vector<256xf32>
    %21 = vector.shape_cast %20 : vector<256xf32> to vector<1x256xf32>
    %22 = vector.broadcast %4 : vector<24x1xi32> to vector<24x256xi32>
    %23 = vector.broadcast %3 : vector<1x256xi32> to vector<24x256xi32>
    %24 = arith.cmpi eq, %22, %23 : vector<24x256xi32>
    %cst_8 = arith.constant 0.000000e+00 : f32
    %25 = vector.broadcast %cst_8 : f32 to vector<24x256xf32>
    %26 = arith.select %24, %19, %25 : vector<24x256xi1>, vector<24x256xf32>
    %cst_9 = arith.constant dense<0.000000e+00> : vector<256xf32>
    %27 = vector.multi_reduction <add>, %26, %cst_9 [0] : vector<24x256xf32> to vector<256xf32>
    %28 = vector.shape_cast %27 : vector<256xf32> to vector<1x256xf32>
    %29 = arith.divf %28, %21 : vector<1x256xf32>
    %cst_10 = arith.constant 9.99999993E-9 : f32
    %cst_11 = arith.constant 1.000000e+00 : f32
    %30 = vector.broadcast %cst_10 : f32 to vector<1x256xf32>
    %31 = arith.maximumf %30, %29 : vector<1x256xf32>
    %32 = vector.broadcast %cst_11 : f32 to vector<1x256xf32>
    %33 = arith.minimumf %32, %31 : vector<1x256xf32>
    %cst_12 = arith.constant 1.000000e+00 : f32
    %34 = vector.broadcast %cst_12 : f32 to vector<1x256xf32>
    %35 = arith.subf %34, %33 : vector<1x256xf32>
    %36 = arith.mulf %35, %35 : vector<1x256xf32>
    %cst_13 = arith.constant -2.500000e-01 : f32
    %37 = vector.broadcast %cst_13 : f32 to vector<1x256xf32>
    %38 = arith.mulf %37, %36 : vector<1x256xf32>
    %39 = math.log %33 : vector<1x256xf32>
    %40 = arith.mulf %38, %39 : vector<1x256xf32>
    %c0_i32 = arith.constant 0 : i32
    %41 = vector.broadcast %c0_i32 : i32 to vector<1x256xi32>
    %42 = arith.cmpi sge, %3, %41 : vector<1x256xi32>
    %c250_i32 = arith.constant 250 : i32
    %43 = vector.broadcast %c250_i32 : i32 to vector<1x256xi32>
    %44 = arith.cmpi ne, %3, %43 : vector<1x256xi32>
    %45 = arith.andi %42, %44 : vector<1x256xi1>
    %cst_14 = arith.constant 0.000000e+00 : f32
    %46 = vector.broadcast %cst_14 : f32 to vector<1x256xf32>
    %47 = arith.select %45, %40, %46 : vector<1x256xi1>, vector<1x256xf32>
    %48 = vector.shape_cast %47 : vector<1x256xf32> to vector<1x1x256xf32>
    %cst_15 = arith.constant dense<0.000000e+00> : vector<1xf32>
    %49 = vector.multi_reduction <add>, %48, %cst_15 [1, 2] : vector<1x1x256xf32> to vector<1xf32>
    %50 = vector.shape_cast %49 : vector<1xf32> to vector<1x1x1xf32>
    %51 = vector.extract %50[0, 0, 0] : f32 from vector<1x1x1xf32>
    %52 = arith.extui %45 : vector<1x256xi1> to vector<1x256xi32>
    %53 = arith.sitofp %52 : vector<1x256xi32> to vector<1x256xf32>
    %54 = vector.shape_cast %53 : vector<1x256xf32> to vector<1x1x256xf32>
    %cst_16 = arith.constant dense<0.000000e+00> : vector<1xf32>
    %55 = vector.multi_reduction <add>, %54, %cst_16 [1, 2] : vector<1x1x256xf32> to vector<1xf32>
    %56 = vector.shape_cast %55 : vector<1xf32> to vector<1x1x1xf32>
    %57 = vector.extract %56[0, 0, 0] : f32 from vector<1x1x1xf32>
    %58 = tpu.iota {dimensions = array<i32: 0>} : vector<8x128xi32>
    %59 = tpu.iota {dimensions = array<i32: 1>} : vector<8x128xi32>
    %c128_i32 = arith.constant 128 : i32
    %60 = vector.broadcast %c128_i32 : i32 to vector<8x128xi32>
    %61 = arith.muli %58, %60 : vector<8x128xi32>
    %62 = arith.addi %61, %59 : vector<8x128xi32>
    %c0_i32_17 = arith.constant 0 : i32
    %63 = vector.broadcast %c0_i32_17 : i32 to vector<8x128xi32>
    %64 = arith.cmpi eq, %62, %63 : vector<8x128xi32>
    %cst_18 = arith.constant 0.000000e+00 : f32
    %65 = vector.broadcast %51 : f32 to vector<8x128xf32>
    %66 = vector.broadcast %cst_18 : f32 to vector<8x128xf32>
    %67 = arith.select %64, %65, %66 : vector<8x128xi1>, vector<8x128xf32>
    %c1_i32 = arith.constant 1 : i32
    %68 = vector.broadcast %c1_i32 : i32 to vector<8x128xi32>
    %69 = arith.cmpi eq, %62, %68 : vector<8x128xi32>
    %70 = vector.broadcast %57 : f32 to vector<8x128xf32>
    %71 = arith.select %69, %70, %67 : vector<8x128xi1>, vector<8x128xf32>
    %c0_19 = arith.constant 0 : index
    %c0_20 = arith.constant 0 : index
    %c0_21 = arith.constant 0 : index
    %c0_22 = arith.constant 0 : index
    %72 = vector.load %arg4[%c0_19, %c0_20, %c0_21, %c0_22] : memref<1x1x8x128xf32, #tpu.memory_space<vmem>>, vector<1x1x8x128xf32>
    %73 = vector.shape_cast %72 : vector<1x1x8x128xf32> to vector<8x128xf32>
    %74 = vector.shape_cast %71 : vector<8x128xf32> to vector<1x1x8x128xf32>
    tpu.vector_store %arg4[%c0_19, %c0_20, %c0_21, %c0_22], %74 {strides = array<i32>} : memref<1x1x8x128xf32, #tpu.memory_space<vmem>>, vector<1x1x8x128xf32>,
    return
  }
  func.func @transform_0(%arg0: i32, %arg1: i32) -> (i32, i32, i32) {
    %c0_i32 = arith.constant 0 : i32
    %c0_i32_0 = arith.constant 0 : i32
    return %arg0, %c0_i32, %arg1 : i32, i32, i32
  }
  func.func @transform_1(%arg0: i32, %arg1: i32) -> (i32, i32, i32) {
    %c0_i32 = arith.constant 0 : i32
    %c0_i32_0 = arith.constant 0 : i32
    return %arg0, %c0_i32, %arg1 : i32, i32, i32
  }
  func.func @transform_2(%arg0: i32, %arg1: i32) -> (i32, i32, i32, i32) {
    %c0_i32 = arith.constant 0 : i32
    %c0_i32_0 = arith.constant 0 : i32
    %c0_i32_1 = arith.constant 0 : i32
    return %arg0, %arg1, %c0_i32, %c0_i32_0 : i32, i32, i32, i32
  }
}

</mosaic_0001>

<bundles_post_ra>
// kernel: tpu_custom_call.1
= control target key start
LH: loop header
LB: loop body
LE: loop exit
PB: predicated region body
PF: predicated region fallthrough
CT: control target
= control target key end

     0   :  { %7 = vsyncpa [#allocation3], 0  ;;  %s1059_s0 = inlined_call_operand.hbm [shape: f32[2,24,256], index: 0, kind: input, shape index: {}]   ;;  %s1060_s1 = inlined_call_operand.hbm [shape: s32[2,1,256], index: 1, kind: input, shape index: {}]   ;;  %s1061_s2 = inlined_call_operand.hbm [shape: f32[2,1,8,128], index: 2, kind: output, shape index: {}]  }
   0x1   :  { %9 = vsyncpa [#allocation3 + $0x1], 0 }
   0x2   :  { %10 = vsyncpa [#allocation6], 0 }
   0x3   :  { %12 = vsyncpa [#allocation6 + $0x1], 0 }
   0x4   :  { %13 = vsyncpa [#allocation4], 0 }
   0x5   :  { %15 = vsyncpa [#allocation4 + $0x1], 0  ;;  %s846_s9 = smov 0   ;;  %s848_s10 = smov 0  }
   0x6   :  { %s850_s11 = smov 0   ;;  %s852_s12 = smov 0  }
   0x7   :  { %s854_s13 = smov 0   ;;  %s856_s14 = smov 0  }
   0x8 LB: > { %s567_s15 = sadd.s32 4294967295, %s822_s14   ;;  %s568_s16 = sadd.s32 4294967294, %s822_s14   ;;  %s822_s14 = sphi %s856_s14, %s21_s14   ;;  %s818_s13 = sphi %s854_s13, %s1072_s13   ;;  %s814_s12 = sphi %s852_s12, %s1071_s12   ;;  %s810_s11 = sphi %s850_s11, %s1070_s11   ;;  %s806_s10 = sphi %s848_s10, %s1069_s10   ;;  %s802_s9 = sphi %s846_s9, %s1068_s9  }
   0x9   : > { %s33_s17 = sadd.s32 1, %s818_s13  ;;  %s42_s18 = sadd.s32 1, %s810_s11 }
   0xa   : > { %p35_p0 = scmp.ge.s32.totalorder %s33_s17, 2  ;;  %p49_p1 = scmp.ne.s32.totalorder %s810_s11, %s806_s10 }
   0xb   : > { %p50_p2 = scmp.eq.s32.totalorder %s822_s14, 0  ;;  %p55_p3 = scmp.ne.s32.totalorder %s806_s10, %s802_s9 }
   0xc   : > { %s1074_s17 = smov (%p35_p0, %s33_s17), 0  ;;  %p56_p5 = scmp.eq.s32.totalorder %s567_s15, 0 }
   0xd   : > { %p887_p4 = por %p50_p2, %p49_p1  ;;  %s37_s20 = ssub.s32 %s818_s13, %s1074_s17 }
   0xe   : > { %p109_p6 = scmp.eq.s32.totalorder %s567_s15, 1  ;;  %p40_p7 = scmp.eq.s32.totalorder %s37_s20, 0 }
   0xf   : > { %p893_p8 = por %p56_p5, %p55_p3  ;;  %p115_p10 = scmp.eq.s32.totalorder %s568_s16, 1 }
  0x10   : > { %p897_p9 = por %p109_p6, %p49_p1  ;;  %p570_p12 = scmp.ge.s32.totalorder %s822_s14, 2 }
  0x11   : > { %s902_s23 = scalar_select %p40_p7, %s810_s11, %s42_s18  }
  0x12   : > { %p904_p11 = por %p115_p10, %p55_p3  ;;  %p608_p13 = scmp.lt.s32.totalorder %s822_s14, 2 }
  0x13   : > { %s911_s25 = sand.u32 1, %s810_s11   ;;  %s585_s27 = smul.u32 768, %s818_s13 }
  0x14   : > { %s584_s26 = smul.u32 48, %s911_s25  ;;  %p917_p0 = pnand %p608_p13, %p887_p4 }
  0x15   : > { %s147_s3 = scalar_lea.hbm %s1059_s0, %s585_s27  ;;  %p575_p1 = scmp.ge.s32.totalorder %s822_s14, 1 }
  0x16   : > { %s139_s4 = scalar_lea.vmem [#allocation2], %s584_s26  ;;  %s136_s6 = scalar_lea.sflag [#allocation3], %s911_s25 }
  0x17   : > { %s148_s5 = sshll.u32 %s139_s4, 4  ;;  %p684_p2 = pneg %p917_p0  ;;  %s149_s5 = int_to_ptr.vmem [resolvable:$true] %s148_s5 }
  0x18   : > { %s695_s7 = scalar_lea.vmem %s149_s5, 768  ;;  %s824_s8 = smov [#allocation2]  }
  0x19   : > { %p696_p3 = scmp.ne.s32.totalorder %s149_s5, %s695_s7  ;;  %s700_s15 = sshll.u32 %s824_s8, 4  ;;  %s701_s15 = int_to_ptr.vmem [resolvable:$false] %s700_s15 }
  0x1a   : > { %s702_s16 = scalar_lea.vmem %s701_s15, 1536  ;;  %p703_p6 = scmp.lt.s32.totalorder %s149_s5, %s701_s15 }
  0x1b   : > { %p698_p4 = pnand %p696_p3, %p684_p2  ;;  %p704_p7 = scmp.lt.s32.totalorder %s702_s16, %s695_s7 }
  0x1d   : > { %p699_p5 = pneg %p698_p4  ;;  %p705_p10 = por %p704_p7, %p703_p6 }
  0x1f   : > { %p706_p13 = pnand %p705_p10, %p699_p5 }
  0x21   : > { %709 = shalt.err (!%p706_p13)
}
  0x22   : > { %s825_s18 = smov 256   ;;  %s826_s19 = smov 16  }
  0x23   : > { %600 = dma.hbm_to_vmem [thread:$0]  (!%p917_p0), %s147_s3, 768, %s149_s5, %s136_s6, %s825_s18, %s825_s18, %s826_s19  }
  0x24   : > { %p177_p3 = scmp.lt.s32.totalorder %s822_s14, 3  ;;  %s572_s20 = sshll.u32 %s911_s25, 1 }
  0x25   : > { %s583_s26 = sshll.u32 %s818_s13, 5  ;;  %s162_s7 = scalar_lea.vmem [#allocation5], %s572_s20 }
  0x26   : > { %p938_p4 = pnand %p575_p1, %p177_p3  ;;  %s170_s4 = scalar_lea.hbm %s1060_s1, %s583_s26 }
  0x27   : > { %s172_s8 = sshll.u32 %s162_s7, 4  ;;  %s159_s15 = scalar_lea.sflag [#allocation6], %s911_s25  ;;  %s173_s8 = int_to_ptr.vmem [resolvable:$true] %s172_s8 }
  0x28   : > { %s723_s16 = scalar_lea.vmem %s173_s8, 32  ;;  %s827_s3 = smov [#allocation5]  }
  0x29   : > { %p724_p5 = scmp.ne.s32.totalorder %s173_s8, %s723_s16  ;;  %s728_s5 = sshll.u32 %s827_s3, 4  ;;  %s729_s5 = int_to_ptr.vmem [resolvable:$false] %s728_s5 }
  0x2a   : > { %s730_s6 = scalar_lea.vmem %s729_s5, 64  ;;  %p731_p1 = scmp.lt.s32.totalorder %s173_s8, %s729_s5 }
  0x2b   : > { %p726_p6 = pnand %p724_p5, %p684_p2  ;;  %p732_p10 = scmp.lt.s32.totalorder %s730_s6, %s723_s16 }
  0x2d   : > { %p727_p7 = pneg %p726_p6  ;;  %p733_p13 = por %p732_p10, %p731_p1 }
  0x2f   : > { %p734_p3 = pnand %p733_p13, %p727_p7 }
  0x31   : > { %737 = shalt.err (!%p734_p3)
}
  0x32   : > { %603 = dma.hbm_to_vmem [thread:$0]  (!%p917_p0), %s170_s4, 32, %s173_s8, %s159_s15  }
  0x33   : > { %181 = sbr.rel (%p938_p4) target bundleno = 391 (0x187), region = 28  ;;  %s954_s25 = sand.u32 (!%p938_p4), 1, %s806_s10  }
  0x34   : > { %s586_s18 = smul.u32 (!%p938_p4), 48, %s954_s25  ;;  %s184_s19 = scalar_lea.sflag (!%p938_p4), [#allocation3], %s954_s25 }
  0x36   : > { %s187_s20 = scalar_lea.vmem (!%p938_p4), [#allocation2], %s586_s18 }
  0x38   : > { %789 = dma.done.wait (%p893_p8), %s184_s19, 768  }
  0x39   : > { %791 = vsyncadd (%p893_p8), %s184_s19, 4294966528  ;;  %s576_s28 = sshll.u32 %s954_s25, 1  ;;  %s193_s26 = scalar_lea.sflag [#allocation6], %s954_s25 }
  0x3a   : > { %s964_s27 = scalar_lea.vmem [#allocation5], %s576_s28 }
  0x3b   : > { %793 = dma.done.wait (%p893_p8), %s193_s26, 32  }
  0x3c   : > { %795 = vsyncadd (%p893_p8), %s193_s26, 4294967264  ;;  %v231_v0 = vlaneseq  ;;  %v224_v3 = vld [vmem:[%s187_s20] sm:$0xff]  ;;  %v225_v4 = vld [vmem:[%s187_s20 + $0x8] sm:$0xff]  ;;  %vm395_vm10 = vcmask 1040384   ;;  %s577_s21 = sshll.u32 %s954_s25, 3  ;;  %s580_s30 = sshll.u32 %s814_s12, 7 }
  0x3d   : > { %v228_v5 = vld [vmem:[%s187_s20 + $0x20] sm:$0xff]  ;;  %v229_v6 = vld [vmem:[%s187_s20 + $0x28] sm:$0xff]  ;;  %v226_v7 = vld [vmem:[%s187_s20 + $0x10] sm:$0xff]  ;;  %s221_s4 = scalar_lea.vmem [#allocation7], %s577_s21  ;;  %s1017_s3 = scalar_lea.hbm %s1061_s2, %s580_s30 }
  0x3e   : > { %v971_v1 = vshrl.u32 %v231_v0, 7  ;;  %v227_v8 = vld [vmem:[%s187_s20 + $0x18] sm:$0xff]  ;;  %v985_v40 = vld [vmem:[%s964_s27] sm:$0x3]  ;;  %s459_s7 = sshll.u32 %s221_s4, 4  ;;  %s445_s5 = scalar_lea.sflag [#allocation4], %s954_s25  ;;  %s460_s7 = int_to_ptr.vmem [resolvable:$true] %s459_s7 }
  0x3f   : > { %vm362_vm7 = vcmp.ge.s32.totalorder %v985_v40, 0  ;;  %vm363_vm8 = vcmp.ne.s32.totalorder %v985_v40, 250  ;;  %s738_s6 = scalar_lea.vmem %s460_s7, 128  ;;  %s830_s12 = smov [#allocation7]  }
  0x40   : > { %v974_v2 = vadd.s32 16, %v971_v1  ;;  %v982_v39 = vsub.s32 0, %v971_v1  ;;  %v988_v41 = vsub.s32 1, %v971_v1  ;;  %v233_v44 = vadd.s32 8, %v971_v1  ;;  %vm364_vm9 = vmand %vm362_vm7, %vm363_vm8  ;;  %p739_p8 = scmp.ne.s32.totalorder %s460_s7, %s738_s6  ;;  %s742_s18 = sshll.u32 %s830_s12, 4  ;;  %s743_s18 = int_to_ptr.vmem [resolvable:$false] %s742_s18 }
  0x41   : > { %s744_s19 = scalar_lea.vmem %s743_s18, 256  ;;  %p745_p4 = scmp.lt.s32.totalorder %s460_s7, %s743_s18 }
  0x42   : > { %vm237_vm0 = vcmp.lt.s32.totalorder %v974_v2, 19  ;;  %v309_v42 = vrot.slane %v985_v40, %v982_v39  ;;  %v313_v43 = vrot.slane %v985_v40, %v988_v41  ;;  %p740_p0 = pnand %p739_p8, %p897_p9  ;;  %p746_p5 = scmp.lt.s32.totalorder %s744_s19, %s738_s6 }
  0x43   : > { %v248_v9 = vsel %vm237_vm0, %v228_v5, -1e+30  ;;  %v249_v10 = vsel %vm237_vm0, %v229_v6, -1e+30 }
  0x44   : > { %v250_v11 = vmax.f32 %v224_v3, %v248_v9  ;;  %v258_v12 = vmax.f32 %v225_v4, %v249_v10  ;;  %vm314_vm1 = vcmp.eq.s32.totalorder %v971_v1, %v309_v42  ;;  %vm315_vm2 = vcmp.eq.s32.totalorder %v971_v1, %v313_v43  ;;  %p741_p2 = pneg %p740_p0  ;;  %p747_p6 = por %p746_p5, %p745_p4 }
  0x45   : > { %vm316_vm3 = vcmp.eq.s32.totalorder %v233_v44, %v309_v42  ;;  %vm317_vm4 = vcmp.eq.s32.totalorder %v233_v44, %v313_v43  ;;  %vm318_vm5 = vcmp.eq.s32.totalorder %v974_v2, %v309_v42  ;;  %vm319_vm6 = vcmp.eq.s32.totalorder %v974_v2, %v313_v43 }
  0x46   : > { %v251_v13 = vmax.f32 %v250_v11, %v226_v7  ;;  %v259_v14 = vmax.f32 %v258_v12, %v227_v8  ;;  %v828_v44 = vmov 1966171168   ;;  %p748_p7 = pnand %p747_p6, %p741_p2 }
  0x48   : > { %v252_v15 = vrot.slane %v251_v13, 4  ;;  %v260_v16 = vrot.slane %v259_v14, 4 }
  0x4a   : > { %v253_v17 = vmax.f32 %v251_v13, %v252_v15  ;;  %v261_v18 = vmax.f32 %v259_v14, %v260_v16 }
  0x4c   : > { %v254_v19 = vrot.slane %v253_v17, 2  ;;  %v262_v20 = vrot.slane %v261_v18, 2 }
  0x4e   : > { %v255_v21 = vmax.f32 %v253_v17, %v254_v19  ;;  %v263_v22 = vmax.f32 %v261_v18, %v262_v20 }
  0x50   : > { %v256_v23 = vrot.slane %v255_v21, 1  ;;  %v264_v24 = vrot.slane %v263_v22, 1 }
  0x52   : > { %v257_v25 = vmax.f32 %v255_v21, %v256_v23  ;;  %v265_v26 = vmax.f32 %v263_v22, %v264_v24 }
  0x54   : > { %v266_v27 = vsub.f32 %v224_v3, %v257_v25  ;;  %v267_v28 = vsub.f32 %v225_v4, %v265_v26  ;;  %v268_v29 = vsub.f32 %v226_v7, %v257_v25  ;;  %v269_v30 = vsub.f32 %v227_v8, %v265_v26 }
  0x55   : > { %v270_v31 = vsub.f32 %v248_v9, %v257_v25  ;;  %v271_v32 = vsub.f32 %v249_v10, %v265_v26 }
  0x56   : > { %v272_v33 = vmul.f32 1.442695, %v266_v27  ;;  %v274_v34 = vmul.f32 1.442695, %v267_v28  ;;  %v276_v35 = vmul.f32 1.442695, %v268_v29 }
  0x57   : > { %v278_v36 = vmul.f32 1.442695, %v269_v30  ;;  %v280_v37 = vmul.f32 1.442695, %v270_v31  ;;  %v282_v38 = vmul.f32 1.442695, %v271_v32 }
  0x58   : > { %662 = vpow2.f32 %v272_v33 }
  0x59   : > { %664 = vpow2.f32 %v274_v34 }
  0x5a   : > { %666 = vpow2.f32 %v276_v35 }
  0x5b   : > { %668 = vpow2.f32 %v278_v36 }
  0x5c   : > { %670 = vpow2.f32 %v280_v37 }
  0x5d   : > { %672 = vpow2.f32 %v282_v38 }
  0x65   : > { %v663_v45 = vpop.eup %662 }
  0x66   : > { %v665_v46 = vpop.eup %664  ;;  %v320_v47 = vsel %vm314_vm1, %v663_v45, 0.0 }
  0x67   : > { %v667_v48 = vpop.eup %666  ;;  %v321_v49 = vsel %vm315_vm2, %v665_v46, 0.0 }
  0x68   : > { %v669_v50 = vpop.eup %668  ;;  %v290_v51 = vadd.f32 %v667_v48, %v663_v45  ;;  %v322_v52 = vsel %vm316_vm3, %v667_v48, 0.0  ;;  %v369_v45 = vunpack.c.l.s4 %v828_v44 }
  0x69   : > { %v671_v53 = vpop.eup %670  ;;  %v298_v54 = vadd.f32 %v669_v50, %v665_v46  ;;  %v323_v55 = vsel %vm317_vm4, %v669_v50, 0.0  ;;  %v326_v56 = vadd.f32 %v322_v52, %v320_v47 }
  0x6a   : > { %v673_v57 = vpop.eup %672  ;;  %v288_v58 = vsel %vm237_vm0, %v671_v53, 0.0  ;;  %v334_v59 = vadd.f32 %v323_v55, %v321_v49  ;;  %v370_v49 = vunpack.c.0.s8 %v369_v45 }
  0x6b   : > { %v289_v60 = vsel %vm237_vm0, %v673_v57, 0.0  ;;  %v291_v61 = vadd.f32 %v290_v51, %v288_v58  ;;  %v324_v62 = vsel %vm318_vm5, %v288_v58, 0.0  ;;  %v829_v58 = vmov 0.0  }
  0x6c   : > { %v299_v63 = vadd.f32 %v298_v54, %v289_v60  ;;  %v325_v3 = vsel %vm319_vm6, %v289_v60, 0.0  ;;  %v327_v4 = vadd.f32 %v326_v56, %v324_v62  ;;  %v373_v55 = vsub.s32 %v370_v49, %v971_v1 }
  0x6d   : > { %v292_v5 = vrot.slane %v291_v61, 4  ;;  %v335_v6 = vadd.f32 %v334_v59, %v325_v3  ;;  %v578_v59 = vsel %vm364_vm9, 1.0, %v829_v58 }
  0x6e   : > { %v300_v7 = vrot.slane %v299_v63, 4  ;;  %v328_v9 = vrot.slane %v327_v4, 4  ;;  %v418_v62 = vrot.slane %v578_v59, %v988_v41 }
  0x6f   : > { %v293_v8 = vadd.f32 %v292_v5, %v291_v61  ;;  %v336_v11 = vrot.slane %v335_v6, 4  ;;  %v414_v61 = vrot.slane %v578_v59, %v982_v39 }
  0x70   : > { %v301_v10 = vadd.f32 %v300_v7, %v299_v63  ;;  %v329_v15 = vadd.f32 %v328_v9, %v327_v4  ;;  %v422_v7 = vsel %vm395_vm10, %v418_v62, 0.0 }
  0x71   : > { %v294_v12 = vrot.slane %v293_v8, 2  ;;  %v337_v17 = vadd.f32 %v336_v11, %v335_v6  ;;  %v421_v6 = vsel %vm395_vm10, %v414_v61, 0.0 }
  0x72   : > { %v302_v13 = vrot.slane %v301_v10, 2  ;;  %v330_v20 = vrot.slane %v329_v15, 2  ;;  %v423_v9 = vadd.f32 %v422_v7, %v421_v6 }
  0x73   : > { %v295_v14 = vadd.f32 %v294_v12, %v293_v8  ;;  %v338_v22 = vrot.slane %v337_v17, 2 }
  0x74   : > { %v303_v16 = vadd.f32 %v302_v13, %v301_v10  ;;  %v331_v23 = vadd.f32 %v330_v20, %v329_v15 }
  0x75   : > { %v296_v2 = vrot.slane %v295_v14, 1  ;;  %v339_v24 = vadd.f32 %v338_v22, %v337_v17  ;;  %v435_v22 = vmul.u32 128, %v971_v1 }
  0x76   : > { %v304_v18 = vrot.slane %v303_v16, 1  ;;  %v332_v25 = vrot.slane %v331_v23, 1 }
  0x77   : > { %v297_v19 = vadd.f32 %v296_v2, %v295_v14  ;;  %v340_v26 = vrot.slane %v339_v24, 1 }
  0x78   : > { %v305_v21 = vadd.f32 %v304_v18, %v303_v16  ;;  %v333_v27 = vadd.f32 %v332_v25, %v331_v23 }
  0x79   : > { %674 = vrcp.f32 %v297_v19  ;;  %v341_v28 = vadd.f32 %v340_v26, %v339_v24 }
  0x7a   : > { %676 = vrcp.f32 %v305_v21  ;;  %v434_v21 = vand.u32 127, %v231_v0 }
  0x7c   : > { %v436_v23 = vadd.s32 %v435_v22, %v434_v21 }
  0x7e   : > { %vm437_vm11 = vcmp.eq.s32.totalorder %v436_v23, 0  ;;  %vm440_vm12 = vcmp.eq.s32.totalorder %v436_v23, 1 }
  0x86   : > { %v675_v29 = vpop.eup %674 }
  0x87   : > { %v677_v30 = vpop.eup %676  ;;  %v343_v31 = vmul.f32 %v675_v29, %v333_v27 }
  0x88   : > { %v345_v32 = vmul.f32 %v677_v30, %v341_v28 }
  0x89   : > { %v346_v33 = vmax.f32 %v343_v31, 1e-08 }
  0x8a   : > { %v347_v34 = vmax.f32 %v345_v32, 1e-08 }
  0x8b   : > { %v348_v35 = vmin.f32 %v346_v33, 1.0 }
  0x8c   : > { %v349_v36 = vmin.f32 %v347_v34, 1.0 }
  0x8d   : > { %678 = vlog2.f32 %v348_v35  ;;  %v350_v37 = vsub.f32 1.0, %v348_v35 }
  0x8e   : > { %680 = vlog2.f32 %v349_v36  ;;  %v351_v38 = vsub.f32 1.0, %v349_v36 }
  0x8f   : > { %v352_v42 = vmul.f32 %v350_v37, %v350_v37 }
  0x90   : > { %v353_v43 = vmul.f32 %v351_v38, %v351_v38 }
  0x91   : > { %v354_v46 = vmul.f32 -0.25, %v352_v42 }
  0x92   : > { %v355_v48 = vmul.f32 -0.25, %v353_v43 }
  0x9a   : > { %v679_v47 = vpop.eup %678 }
  0x9b   : > { %v681_v50 = vpop.eup %680  ;;  %v357_v51 = vmul.f32 0.6931472, %v679_v47 }
  0x9c   : > { %v359_v52 = vmul.f32 0.6931472, %v681_v50 }
  0x9d   : > { %v360_v53 = vmul.f32 %v357_v51, %v354_v46 }
  0x9e   : > { %v361_v54 = vmul.f32 %v359_v52, %v355_v48 }
  0xa0   : > { %v367_v56 = vcombine.low %v360_v53, %v361_v54 }
  0xa2   : > { %v374_v57 = vrot.slane %v367_v56, %v373_v55 }
  0xa4   : > { %v381_v60 = vrot.slane %v374_v57, %v373_v55 }
  0xa6   : > { %v383_v63 = vsel %vm364_vm9, %v381_v60, 0.0 }
  0xa7   : > { %v388_v3 = vrot.slane %v383_v63, %v982_v39  ;;  %v392_v4 = vrot.slane %v383_v63, %v988_v41 }
  0xa9   : > { %v396_v5 = vsel %vm395_vm10, %v388_v3, 0.0  ;;  %v397_v40 = vsel %vm395_vm10, %v392_v4, 0.0 }
  0xaa   : > { %v398_v8 = vadd.f32 %v397_v40, %v396_v5 }
  0xac   : > { %399 = vadd.xlane.f32.xlu0 %v398_v8 }
  0xb0   : > { %424 = vadd.xlane.f32.xlu0 %v423_v9 }
 0x135   : > { %v400_v10 = vpop.xlane.xlu0 %399 }
 0x136   : > { %v401_v11 = vrot.slane %v400_v10, 4 }
 0x138   : > { %v402_v12 = vadd.f32 %v401_v11, %v400_v10 }
 0x139   : > { %v425_v13 = vpop.xlane.xlu0 %424 }
 0x13a   : > { %v403_v14 = vrot.slane %v402_v12, 2  ;;  %v426_v15 = vrot.slane %v425_v13, 4 }
 0x13c   : > { %v427_v16 = vadd.f32 %v426_v15, %v425_v13  ;;  %v404_v17 = vadd.f32 %v403_v14, %v402_v12 }
 0x13e   : > { %v428_v39 = vrot.slane %v427_v16, 2  ;;  %v405_v41 = vrot.slane %v404_v17, 1 }
 0x140   : > { %v429_v2 = vadd.f32 %v428_v39, %v427_v16  ;;  %v406_v18 = vadd.f32 %v405_v41, %v404_v17 }
 0x142   : > { %587 = vpush %v406_v18  ;;  %v430_v19 = vrot.slane %v429_v2, 1 }
 0x144   : > { %v431_v20 = vadd.f32 %v430_v19, %v429_v2 }
 0x146   : > { %589 = vpush %v431_v20 }
 0x173   : > { %s588_s29 = spop %587 }
 0x174   : > { %v438_v24 = vstv %s588_s29 }
 0x175   : > { %v439_v25 = vsel %vm437_vm11, %v438_v24, 0.0 }
 0x177   : > { %s590_s8 = spop %589 }
 0x178   : > { %v441_v26 = vstv %s590_s8 }
 0x179   : > { %v442_v0 = vsel %vm440_vm12, %v441_v26, %v439_v25 }
 0x17a   : > { %443 = vst [vmem:[%s221_s4] sm:$0xff] %v442_v0 }
 0x17b   : > { %751 = shalt.err (!%p748_p7)
}
 0x17c   : > { %s752_s20 = scalar_lea.hbm %s1017_s3, 128  ;;  %s756_s26 = scalar_lea.hbm %s1061_s2, 256 }
 0x17d   : > { %p753_p1 = scmp.ne.s32.totalorder %s1017_s3, %s752_s20  ;;  %p757_p3 = scmp.lt.s32.totalorder %s1017_s3, %s1061_s2 }
 0x17e   : > { %p758_p8 = scmp.lt.s32.totalorder %s756_s26, %s752_s20 }
 0x17f   : > { %p754_p10 = pnand %p753_p1, %p897_p9 }
 0x180   : > { %p759_p0 = por %p758_p8, %p757_p3 }
 0x181   : > { %p755_p13 = pneg %p754_p10 }
 0x183   : > { %p760_p2 = pnand %p759_p0, %p755_p13 }
 0x185   : > { %763 = shalt.err (!%p760_p2)
}
 0x186   : > { %595 = dma.vmem_to_hbm [thread:$0]  (%p897_p9), %s460_s7, 128, %s1017_s3, %s445_s5  }
 0x187 PF: > { %s471_s29 = sand.u32 1, %s802_s9   ;;  %p605_p4 = pnand %p570_p12, %p904_p11 }
 0x188   : > { %s472_s30 = scalar_lea.sflag [#allocation4], %s471_s29 }
 0x189   : > { %p606_p5 = pneg %p605_p4 }
 0x18b   : > { %797 = dma.done.wait (%p606_p5), %s472_s30, 128  }
 0x18c   : > { %799 = vsyncadd (%p606_p5), %s472_s30, 4294967168  ;;  %s21_s14 = sadd.s32 1, %s822_s14   ;;  %s1068_s9 = smov %s806_s10 }
 0x18d   : > { %p18_p6 = scmp.ge.s32.totalorder %s21_s14, 4   ;;  %s1069_s10 = smov %s810_s11 }
 0x18e   : > { %s1070_s11 = smov %s902_s23  ;;  %s1071_s12 = smov %s818_s13 }
 0x18f   : > { %s1072_s13 = smov %s1074_s17  ;;  %20 = sbr.rel (!%p18_p6) target bundleno = 8 (0x8), region = 86 }
 0x194   :  { %477 = vsyncpa [#allocation3], 1 }
 0x195   :  { %479 = vsyncpa [#allocation3 + $0x1], 1 }
 0x196   :  { %480 = vsyncpa [#allocation6], 1 }
 0x197   :  { %482 = vsyncpa [#allocation6 + $0x1], 1 }
 0x198   :  { %483 = vsyncpa [#allocation4], 1 }
 0x199   :  { %485 = vsyncpa [#allocation4 + $0x1], 1 }

</bundles_post_ra>
